<compile_context>
chip_gen: v5e
topology: v5e:2x2
jax: 0.10.0
libtpu: 0.0.40
codegen_flags: <defaults>
</compile_context>

<pallas_src>
import functools

import jax
import jax.numpy as jnp
from jax.experimental import pallas as pl
from jax.experimental.pallas import tpu as pltpu


def _round_up(n: int, m: int) -> int:
    return ((n + m - 1) // m) * m


def _mlp_kernel(x_ref, w1_ref, b1_ref, w2_ref, b2_ref, o_ref):
    # (TM, indim_p) @ (indim_p, hiddim_p) -> f32 accumulate on the MXU.
    h = jnp.dot(x_ref[...], w1_ref[...], preferred_element_type=jnp.float32)
    h = h + b1_ref[...]            # (1, hiddim_p) broadcast, f32 on the VPU
    h = jax.nn.sigmoid(h)          # f32 transcendental -> EUP slot
    # Second matmul: cast activations to the weight dtype (no-op for f32).
    o = jnp.dot(h.astype(w2_ref.dtype), w2_ref[...],
                preferred_element_type=jnp.float32)
    o = o + b2_ref[...]            # (1, outdim_p) broadcast
    o_ref[...] = o.astype(o_ref.dtype)


def _pad2d(a, rows, cols, dtype):
    """Zero-pad a 2-D array up to (rows, cols); no-op copy avoided when aligned."""
    a = a.astype(dtype)
    r, c = a.shape
    if r == rows and c == cols:
        return a
    return jnp.zeros((rows, cols), dtype).at[:r, :c].set(a)


def mlp_forward(x, w1, b1, w2, b2, *, tm=512, compute_dtype=jnp.float32,
                vmem_budget_bytes=24 << 20):
    """Forward pass: sigmoid(x @ w1 + b1) @ w2 + b2.

    x:  (B, indim)         w1: (indim, hiddim)   b1: (1, hiddim) or (hiddim,)
    w2: (hiddim, outdim)   b2: (1, outdim) or (outdim,)
    Returns (B, outdim) float32.
    """
    B, indim = x.shape
    hiddim = w1.shape[1]
    outdim = w2.shape[1]

    # Lane-dense (128-multiple) padded dims.
    indim_p = _round_up(indim, 128)
    hiddim_p = _round_up(hiddim, 128)
    outdim_p = _round_up(outdim, 128)

    cd = jnp.dtype(compute_dtype)
    wbytes = cd.itemsize

    # Batch tile: multiple of 8, no larger than the (rounded) batch; shrink
    # until the double-buffered working set fits the conservative VMEM budget.
    TM = min(_round_up(B, 8), max(8, _round_up(tm, 8)))

    def _working_set(t):
        tiles = 2 * (t * indim_p * wbytes + t * outdim_p * 4)        # x/out dbl-buf
        resident = (indim_p * hiddim_p + hiddim_p * outdim_p) * wbytes
        resident += (hiddim_p + outdim_p) * 4                        # biases (f32)
        return tiles + resident

    while TM > 8 and _working_set(TM) > vmem_budget_bytes:
        TM = max(8, _round_up(TM // 2, 8))

    B_pad = _round_up(B, TM)

    # Zero-pad everything (exact — see module docstring).
    xp = _pad2d(x, B_pad, indim_p, cd)
    w1p = _pad2d(w1, indim_p, hiddim_p, cd)
    b1p = _pad2d(b1.reshape(1, hiddim), 1, hiddim_p, jnp.float32)
    w2p = _pad2d(w2, hiddim_p, outdim_p, cd)
    b2p = _pad2d(b2.reshape(1, outdim), 1, outdim_p, jnp.float32)

    out_p = pl.pallas_call(
        _mlp_kernel,
        out_shape=jax.ShapeDtypeStruct((B_pad, outdim_p), jnp.float32),
        grid=(B_pad // TM,),
        in_specs=[
            pl.BlockSpec((TM, indim_p), lambda i: (i, 0)),        # streamed x tile
            pl.BlockSpec((indim_p, hiddim_p), lambda i: (0, 0)),  # resident W1
            pl.BlockSpec((1, hiddim_p), lambda i: (0, 0)),        # resident b1
            pl.BlockSpec((hiddim_p, outdim_p), lambda i: (0, 0)), # resident W2
            pl.BlockSpec((1, outdim_p), lambda i: (0, 0)),        # resident b2
        ],
        out_specs=pl.BlockSpec((TM, outdim_p), lambda i: (i, 0)),
        compiler_params=pltpu.CompilerParams(
            dimension_semantics=("parallel",),                    # v7x: 2 TCs
            vmem_limit_bytes=max(vmem_budget_bytes, 32 << 20)),
    )(xp, w1p, b1p, w2p, b2p)

    # Strip batch / lane padding.
    if B_pad == B and outdim_p == outdim:
        return out_p
    return out_p[:B, :outdim]


def init_params(key, indim, hiddim, outdim):
    # Deterministic init mimicking nn.Linear's uniform(-1/sqrt(fan_in), 1/sqrt(fan_in)).
    k1, k2, k3, k4 = jax.random.split(key, 4)
    s1 = 1.0 / jnp.sqrt(indim)
    s2 = 1.0 / jnp.sqrt(hiddim)
    w1 = jax.random.uniform(k1, (indim, hiddim), jnp.float32, -s1, s1)
    b1 = jax.random.uniform(k2, (1, hiddim), jnp.float32, -s1, s1)
    w2 = jax.random.uniform(k3, (hiddim, outdim), jnp.float32, -s2, s2)
    b2 = jax.random.uniform(k4, (1, outdim), jnp.float32, -s2, s2)
    return w1, b1, w2, b2


if __name__ == "__main__":
    indim, hiddim, outdim = 32, 64, 16
    batch = 200   # not a multiple of the tile -> exercises batch padding + grid > 1

    key = jax.random.PRNGKey(0)
    kx, kp = jax.random.split(key)
    x = jax.random.normal(kx, (batch, indim), jnp.float32)
    w1, b1, w2, b2 = init_params(kp, indim, hiddim, outdim)

    # tm=64 -> 4 batch tiles at this toy size; at real sizes use the default
    # tm=512 (auto-shrinks for v7x's smaller VMEM budget).
    fwd = jax.jit(functools.partial(mlp_forward, tm=64))
    out = fwd(x, w1, b1, w2, b2)
    jax.block_until_ready(out)

    # Reference check in plain JAX (same math as the PyTorch module).
    ref = jax.nn.sigmoid(x @ w1 + b1) @ w2 + b2
    assert out.shape == (batch, outdim)
    assert jnp.allclose(out, ref, atol=1e-5, rtol=1e-5), float(
        jnp.max(jnp.abs(out - ref)))

    print("KERNEL_OK")
</pallas_src>

<mosaic_0001>
module attributes {stable_mosaic.version = 11 : i64} {
  func.func @_mlp_kernel(%arg0: i32, %arg1: memref<64x128xf32, #tpu.memory_space<vmem>>, %arg2: memref<128x128xf32, #tpu.memory_space<vmem>>, %arg3: memref<1x128xf32, #tpu.memory_space<vmem>>, %arg4: memref<128x128xf32, #tpu.memory_space<vmem>>, %arg5: memref<1x128xf32, #tpu.memory_space<vmem>>, %arg6: memref<64x128xf32, #tpu.memory_space<vmem>>) attributes {dimension_semantics = [#tpu.dimension_semantics<parallel>], iteration_bounds = array<i64: 4>, scalar_prefetch = 0 : i64, scratch_operands = 0 : i64, tpu.core_type = #tpu.core_type<tc>, window_params = [{transform_indices = @transform_0, window_bounds = array<i64: 64, 128>}, {pipeline_mode = #tpu.pipeline_mode<synchronous>, transform_indices = @transform_1, window_bounds = array<i64: 128, 128>}, {pipeline_mode = #tpu.pipeline_mode<synchronous>, transform_indices = @transform_2, window_bounds = array<i64: 1, 128>}, {pipeline_mode = #tpu.pipeline_mode<synchronous>, transform_indices = @transform_3, window_bounds = array<i64: 128, 128>}, {pipeline_mode = #tpu.pipeline_mode<synchronous>, transform_indices = @transform_4, window_bounds = array<i64: 1, 128>}, {transform_indices = @transform_5, window_bounds = array<i64: 64, 128>}]} {
    %c0 = arith.constant 0 : index
    %c0_0 = arith.constant 0 : index
    %0 = vector.load %arg1[%c0, %c0_0] : memref<64x128xf32, #tpu.memory_space<vmem>>, vector<64x128xf32>
    %c0_1 = arith.constant 0 : index
    %c0_2 = arith.constant 0 : index
    %1 = vector.load %arg2[%c0_1, %c0_2] : memref<128x128xf32, #tpu.memory_space<vmem>>, vector<128x128xf32>
    %cst = arith.constant dense<0.000000e+00> : vector<64x128xf32>
    %2 = tpu.matmul %0, %1, %cst {dimension_numbers = #tpu.dot_dimension_numbers<[1], [0], [0], [1], [0, 0, 1, 1], [], []>} : vector<64x128xf32>, vector<128x128xf32>, vector<64x128xf32> -> vector<64x128xf32>
    %c0_3 = arith.constant 0 : index
    %c0_4 = arith.constant 0 : index
    %3 = vector.load %arg3[%c0_3, %c0_4] : memref<1x128xf32, #tpu.memory_space<vmem>>, vector<1x128xf32>
    %4 = vector.broadcast %3 : vector<1x128xf32> to vector<64x128xf32>
    %5 = arith.addf %2, %4 : vector<64x128xf32>
    %6 = arith.negf %5 : vector<64x128xf32>
    %7 = math.exp %6 : vector<64x128xf32>
    %cst_5 = arith.constant 1.000000e+00 : f32
    %8 = vector.broadcast %cst_5 : f32 to vector<64x128xf32>
    %9 = arith.addf %8, %7 : vector<64x128xf32>
    %10 = arith.divf %8, %9 : vector<64x128xf32>
    %c0_6 = arith.constant 0 : index
    %c0_7 = arith.constant 0 : index
    %11 = vector.load %arg4[%c0_6, %c0_7] : memref<128x128xf32, #tpu.memory_space<vmem>>, vector<128x128xf32>
    %cst_8 = arith.constant dense<0.000000e+00> : vector<64x128xf32>
    %12 = tpu.matmul %10, %11, %cst_8 {dimension_numbers = #tpu.dot_dimension_numbers<[1], [0], [0], [1], [0, 0, 1, 1], [], []>} : vector<64x128xf32>, vector<128x128xf32>, vector<64x128xf32> -> vector<64x128xf32>
    %c0_9 = arith.constant 0 : index
    %c0_10 = arith.constant 0 : index
    %13 = vector.load %arg5[%c0_9, %c0_10] : memref<1x128xf32, #tpu.memory_space<vmem>>, vector<1x128xf32>
    %14 = vector.broadcast %13 : vector<1x128xf32> to vector<64x128xf32>
    %15 = arith.addf %12, %14 : vector<64x128xf32>
    %c0_11 = arith.constant 0 : index
    %c0_12 = arith.constant 0 : index
    %16 = vector.load %arg6[%c0_11, %c0_12] : memref<64x128xf32, #tpu.memory_space<vmem>>, vector<64x128xf32>
    tpu.vector_store %arg6[%c0_11, %c0_12], %15 {strides = array<i32>} : memref<64x128xf32, #tpu.memory_space<vmem>>, vector<64x128xf32>,
    return
  }
  func.func @transform_0(%arg0: i32) -> (i32, i32) {
    %c0_i32 = arith.constant 0 : i32
    %c0_i32_0 = arith.constant 0 : i32
    return %arg0, %c0_i32 : i32, i32
  }
  func.func @transform_1(%arg0: i32) -> (i32, i32) {
    %c0_i32 = arith.constant 0 : i32
    %c0_i32_0 = arith.constant 0 : i32
    %c0_i32_1 = arith.constant 0 : i32
    return %c0_i32, %c0_i32_0 : i32, i32
  }
  func.func @transform_2(%arg0: i32) -> (i32, i32) {
    %c0_i32 = arith.constant 0 : i32
    %c0_i32_0 = arith.constant 0 : i32
    %c0_i32_1 = arith.constant 0 : i32
    return %c0_i32, %c0_i32_0 : i32, i32
  }
  func.func @transform_3(%arg0: i32) -> (i32, i32) {
    %c0_i32 = arith.constant 0 : i32
    %c0_i32_0 = arith.constant 0 : i32
    %c0_i32_1 = arith.constant 0 : i32
    return %c0_i32, %c0_i32_0 : i32, i32
  }
  func.func @transform_4(%arg0: i32) -> (i32, i32) {
    %c0_i32 = arith.constant 0 : i32
    %c0_i32_0 = arith.constant 0 : i32
    %c0_i32_1 = arith.constant 0 : i32
    return %c0_i32, %c0_i32_0 : i32, i32
  }
  func.func @transform_5(%arg0: i32) -> (i32, i32) {
    %c0_i32 = arith.constant 0 : i32
    %c0_i32_0 = arith.constant 0 : i32
    return %arg0, %c0_i32 : i32, i32
  }
}

</mosaic_0001>

<bundles_post_ra>
// kernel: mlp_forward.1
= control target key start
LH: loop header
LB: loop body
LE: loop exit
PB: predicated region body
PF: predicated region fallthrough
CT: control target
= control target key end

     0   :  { %s705_s18 = smov 0   ;;  %s907_s0 = inlined_call_operand.vmem [shape: f32[256,128], index: 0, kind: input, shape index: {}]   ;;  %s908_s1 = inlined_call_operand.vmem [shape: f32[128,128], index: 1, kind: input, shape index: {}]   ;;  %s909_s2 = inlined_call_operand.vmem [shape: f32[1,128], index: 2, kind: input, shape index: {}]   ;;  %s910_s3 = inlined_call_operand.vmem [shape: f32[128,128], index: 3, kind: input, shape index: {}]   ;;  %s911_s4 = inlined_call_operand.vmem [shape: f32[1,128], index: 4, kind: input, shape index: {}]   ;;  %s912_s5 = inlined_call_operand.vmem [shape: f32[256,128], index: 5, kind: output, shape index: {}]  }
   0x1 LB: > { %s574_s19 = sadd.s32 4294967295, %s673_s18   ;;  %p578_p0 = scmp.ge.s32.totalorder %s673_s18, 1  ;;  %s673_s18 = sphi %s705_s18, %s15_s18  }
   0x2   : > { %p188_p1 = scmp.lt.s32.totalorder %s673_s18, 5 }
   0x4   : > { %p189_p2 = pnand %p578_p0, %p188_p1 }
   0x5   : > { %s579_s11 = sshll.u32 (!%p189_p2), %s574_s19, 3 }
   0x6   : > { %192 = sbr.rel (%p189_p2) target bundleno = 364 (0x16c), region = 40  ;;  %p217_p3 = scmp.lt.s32.totalorder (!%p189_p2), %s579_s11, 31 }
   0xb   : > { %v251_v0 = vld [vmem:[%s908_s1 + $0x78] sm:$0xff]  ;;  %v250_v1 = vld [vmem:[%s908_s1 + $0x70] sm:$0xff]  ;;  %v249_v2 = vld [vmem:[%s908_s1 + $0x68] sm:$0xff]  ;;  %s928_s11 = smov (!%p217_p3, %s579_s11), 31 }
   0xc   : > { %256 = vmatpush.msra.mxu0 %v251_v0  ;;  %593 = vmatpush.msra.mxu2 %v251_v0  ;;  %v248_v3 = vld [vmem:[%s908_s1 + $0x60] sm:$0xff]  ;;  %v247_v4 = vld [vmem:[%s908_s1 + $0x58] sm:$0xff]  ;;  %v246_v5 = vld [vmem:[%s908_s1 + $0x50] sm:$0xff]  ;;  %s580_s23 = sshll.u32 %s928_s11, 3 }
   0xd   : > { %v245_v6 = vld [vmem:[%s908_s1 + $0x48] sm:$0xff]  ;;  %v244_v7 = vld [vmem:[%s908_s1 + $0x40] sm:$0xff]  ;;  %v243_v8 = vld [vmem:[%s908_s1 + $0x38] sm:$0xff]  ;;  %s220_s30 = scalar_lea.vmem %s907_s0, %s580_s23  ;;  %s226_s27 = scalar_lea.vmem %s912_s5, %s580_s23 }
   0xe   : > { %257 = vmatpush.msra.mxu0 %v250_v1  ;;  %594 = vmatpush.msra.mxu2 %v250_v1  ;;  %v242_v9 = vld [vmem:[%s908_s1 + $0x30] sm:$0xff]  ;;  %v241_v10 = vld [vmem:[%s908_s1 + $0x28] sm:$0xff]  ;;  %v240_v11 = vld [vmem:[%s908_s1 + $0x20] sm:$0xff] }
   0xf   : > { %v239_v12 = vld [vmem:[%s908_s1 + $0x18] sm:$0xff]  ;;  %v238_v13 = vld [vmem:[%s908_s1 + $0x10] sm:$0xff]  ;;  %v237_v14 = vld [vmem:[%s908_s1 + $0x8] sm:$0xff] }
  0x10   : > { %258 = vmatpush.msra.mxu0 %v249_v2  ;;  %595 = vmatpush.msra.mxu2 %v249_v2  ;;  %v236_v15 = vld [vmem:[%s908_s1] sm:$0xff]  ;;  %v229_v18 = vld [vmem:[%s220_s30 + $0x8] sm:$0xff]  ;;  %v230_v20 = vld [vmem:[%s220_s30 + $0x10] sm:$0xff] }
  0x11   : > { %v228_v16 = vld [vmem:[%s220_s30] sm:$0xff]  ;;  %v233_v19 = vld [vmem:[%s220_s30 + $0x28] sm:$0xff]  ;;  %v234_v21 = vld [vmem:[%s220_s30 + $0x30] sm:$0xff] }
  0x12   : > { %259 = vmatpush.msra.mxu0 %v248_v3  ;;  %596 = vmatpush.msra.mxu2 %v248_v3  ;;  %v232_v17 = vld [vmem:[%s220_s30 + $0x20] sm:$0xff]  ;;  %v231_v22 = vld [vmem:[%s220_s30 + $0x18] sm:$0xff]  ;;  %v463_v25 = vld [vmem:[%s910_s3 + $0x70] sm:$0xff] }
  0x13   : > { %v235_v23 = vld [vmem:[%s220_s30 + $0x38] sm:$0xff]  ;;  %v462_v26 = vld [vmem:[%s910_s3 + $0x68] sm:$0xff]  ;;  %v461_v27 = vld [vmem:[%s910_s3 + $0x60] sm:$0xff] }
  0x14   : > { %260 = vmatpush.msra.mxu0 %v247_v4  ;;  %597 = vmatpush.msra.mxu2 %v247_v4  ;;  %v464_v24 = vld [vmem:[%s910_s3 + $0x78] sm:$0xff]  ;;  %v459_v29 = vld [vmem:[%s910_s3 + $0x50] sm:$0xff]  ;;  %v458_v30 = vld [vmem:[%s910_s3 + $0x48] sm:$0xff] }
  0x15   : > { %469 = vmatpush.msra.mxu1 %v464_v24  ;;  %609 = vmatpush.msra.mxu3 %v464_v24  ;;  %v460_v28 = vld [vmem:[%s910_s3 + $0x58] sm:$0xff]  ;;  %v457_v31 = vld [vmem:[%s910_s3 + $0x40] sm:$0xff]  ;;  %v455_v33 = vld [vmem:[%s910_s3 + $0x30] sm:$0xff] }
  0x16   : > { %261 = vmatpush.msra.mxu0 %v246_v5  ;;  %598 = vmatpush.msra.mxu2 %v246_v5  ;;  %v456_v32 = vld [vmem:[%s910_s3 + $0x38] sm:$0xff]  ;;  %v454_v34 = vld [vmem:[%s910_s3 + $0x28] sm:$0xff]  ;;  %v453_v35 = vld [vmem:[%s910_s3 + $0x20] sm:$0xff] }
  0x17   : > { %470 = vmatpush.msra.mxu1 %v463_v25  ;;  %610 = vmatpush.msra.mxu3 %v463_v25  ;;  %v452_v36 = vld [vmem:[%s910_s3 + $0x18] sm:$0xff]  ;;  %v451_v37 = vld [vmem:[%s910_s3 + $0x10] sm:$0xff]  ;;  %v450_v38 = vld [vmem:[%s910_s3 + $0x8] sm:$0xff] }
  0x18   : > { %262 = vmatpush.msra.mxu0 %v245_v6  ;;  %599 = vmatpush.msra.mxu2 %v245_v6  ;;  %v817_v39 = vld [vmem:[%s909_s2] ss:$0 sm:$0xff] }
  0x19   : > { %471 = vmatpush.msra.mxu1 %v462_v26  ;;  %611 = vmatpush.msra.mxu3 %v462_v26  ;;  %v449_v40 = vld [vmem:[%s910_s3] sm:$0xff] }
  0x1a   : > { %263 = vmatpush.msra.mxu0 %v244_v7  ;;  %600 = vmatpush.msra.mxu2 %v244_v7 }
  0x1b   : > { %472 = vmatpush.msra.mxu1 %v461_v27  ;;  %612 = vmatpush.msra.mxu3 %v461_v27 }
  0x1c   : > { %264 = vmatpush.msra.mxu0 %v243_v8  ;;  %601 = vmatpush.msra.mxu2 %v243_v8 }
  0x1d   : > { %473 = vmatpush.msra.mxu1 %v460_v28  ;;  %613 = vmatpush.msra.mxu3 %v460_v28 }
  0x1e   : > { %265 = vmatpush.msra.mxu0 %v242_v9  ;;  %602 = vmatpush.msra.mxu2 %v242_v9 }
  0x1f   : > { %474 = vmatpush.msra.mxu1 %v459_v29  ;;  %614 = vmatpush.msra.mxu3 %v459_v29 }
  0x20   : > { %266 = vmatpush.msra.mxu0 %v241_v10  ;;  %603 = vmatpush.msra.mxu2 %v241_v10 }
  0x21   : > { %475 = vmatpush.msra.mxu1 %v458_v30  ;;  %615 = vmatpush.msra.mxu3 %v458_v30 }
  0x22   : > { %267 = vmatpush.msra.mxu0 %v240_v11  ;;  %604 = vmatpush.msra.mxu2 %v240_v11 }
  0x23   : > { %476 = vmatpush.msra.mxu1 %v457_v31  ;;  %616 = vmatpush.msra.mxu3 %v457_v31 }
  0x24   : > { %268 = vmatpush.msra.mxu0 %v239_v12  ;;  %605 = vmatpush.msra.mxu2 %v239_v12 }
  0x25   : > { %477 = vmatpush.msra.mxu1 %v456_v32  ;;  %617 = vmatpush.msra.mxu3 %v456_v32 }
  0x26   : > { %269 = vmatpush.msra.mxu0 %v238_v13  ;;  %606 = vmatpush.msra.mxu2 %v238_v13 }
  0x27   : > { %478 = vmatpush.msra.mxu1 %v455_v33  ;;  %618 = vmatpush.msra.mxu3 %v455_v33 }
  0x28   : > { %270 = vmatpush.msra.mxu0 %v237_v14  ;;  %607 = vmatpush.msra.mxu2 %v237_v14 }
  0x29   : > { %479 = vmatpush.msra.mxu1 %v454_v34  ;;  %619 = vmatpush.msra.mxu3 %v454_v34 }
  0x2a   : > { %271 = vmatpush.msra.mxu0 %v236_v15  ;;  %608 = vmatpush.msra.mxu2 %v236_v15 }
  0x2b   : > { %272 = vmatmul.f32.vlgmr.msra.gmra.mxu0 %v228_v16  ;;  %284 = vmatmul.f32.vlgmr.msra.gmra.mxu2 %v232_v17 }
  0x2c   : > { %480 = vmatpush.msra.mxu1 %v453_v35  ;;  %620 = vmatpush.msra.mxu3 %v453_v35 }
  0x2e   : > { %481 = vmatpush.msra.mxu1 %v452_v36  ;;  %621 = vmatpush.msra.mxu3 %v452_v36 }
  0x30   : > { %482 = vmatpush.msra.mxu1 %v451_v37  ;;  %622 = vmatpush.msra.mxu3 %v451_v37 }
  0x32   : > { %483 = vmatpush.msra.mxu1 %v450_v38  ;;  %623 = vmatpush.msra.mxu3 %v450_v38 }
  0x33   : > { %275 = vmatmul.f32.gmra.mxu0 %v229_v18  ;;  %287 = vmatmul.f32.gmra.mxu2 %v233_v19 }
  0x34   : > { %484 = vmatpush.msra.mxu1 %v449_v40  ;;  %624 = vmatpush.msra.mxu3 %v449_v40 }
  0x3b   : > { %278 = vmatmul.f32.gmra.mxu0 %v230_v20  ;;  %290 = vmatmul.f32.gmra.mxu2 %v234_v21 }
  0x43   : > { %281 = vmatmul.f32.gmra.mxu0 %v231_v22  ;;  %293 = vmatmul.f32.gmra.mxu2 %v235_v23 }
  0xa8   : > { %v273_v41 = vpop.f32.mrf.mxu0 }
  0xa9   : > { %v274_v42 = vadd.f32 %v817_v39, %v273_v41 }
  0xab   : > { %v583_v43 = vmul.f32 -1.442695, %v274_v42 }
  0xad   : > { %635 = vpow2.f32 %v583_v43 }
  0xae   : > { %v285_v44 = vpop.f32.mrf.mxu2 }
  0xaf   : > { %v286_v45 = vadd.f32 %v817_v39, %v285_v44 }
  0xb0   : > { %v276_v46 = vpop.f32.mrf.mxu0 }
  0xb1   : > { %v587_v47 = vmul.f32 -1.442695, %v286_v45  ;;  %v277_v48 = vadd.f32 %v817_v39, %v276_v46 }
  0xb3   : > { %v636_v49 = vpop.eup %635  ;;  %637 = vpow2.f32 %v587_v47  ;;  %v584_v50 = vmul.f32 -1.442695, %v277_v48 }
  0xb4   : > { %v321_v51 = vadd.f32 1.0, %v636_v49 }
  0xb5   : > { %639 = vpow2.f32 %v584_v50 }
  0xb6   : > { %641 = vrcp.f32 %v321_v51  ;;  %v288_v52 = vpop.f32.mrf.mxu2  ;;  %v338_v0 = vand.u32 2147483647, %v321_v51  ;;  %v340_v2 = vand.u32 2147483648, %v321_v51  ;;  %vm334_vm0 = vweird.f32 %v321_v51 }
  0xb7   : > { %v289_v53 = vadd.f32 %v817_v39, %v288_v52 }
  0xb8   : > { %v279_v54 = vpop.f32.mrf.mxu0  ;;  %vm829_vm2 = vcmp.eq.f32.partialorder %v338_v0, 8.507059e+37  ;;  %v341_v14 = vor.u32 1.1754944e-38, %v340_v2 }
  0xb9   : > { %v638_v55 = vpop.eup %637  ;;  %v588_v56 = vmul.f32 -1.442695, %v289_v53  ;;  %v280_v57 = vadd.f32 %v817_v39, %v279_v54 }
  0xba   : > { %v325_v58 = vadd.f32 1.0, %v638_v55 }
  0xbb   : > { %v640_v59 = vpop.eup %639  ;;  %643 = vpow2.f32 %v588_v56  ;;  %v585_v60 = vmul.f32 -1.442695, %v280_v57 }
  0xbc   : > { %v642_v61 = vpop.eup %641  ;;  %645 = vrcp.f32 %v325_v58  ;;  %v322_v62 = vadd.f32 1.0, %v640_v59  ;;  %v398_v15 = vand.u32 2147483647, %v325_v58  ;;  %v400_v16 = vand.u32 2147483648, %v325_v58 }
  0xbd   : > { %647 = vpow2.f32 %v585_v60  ;;  %v330_v63 = vmul.f32 %v642_v61, %v321_v51  ;;  %vm335_vm1 = vweird.f32 %v642_v61  ;;  %vm394_vm7 = vweird.f32 %v325_v58 }
  0xbe   : > { %649 = vrcp.f32 %v322_v62  ;;  %v291_v1 = vpop.f32.mrf.mxu2  ;;  %vm835_vm3 = vmor %vm334_vm0, %vm335_vm1  ;;  %vm349_vm4 = vweird.f32 %v322_v62  ;;  %v353_v23 = vand.u32 2147483647, %v322_v62  ;;  %v355_v29 = vand.u32 2147483648, %v322_v62 }
  0xbf   : > { %v292_v3 = vadd.f32 %v817_v39, %v291_v1  ;;  %v331_v4 = vsub.f32 1.0, %v330_v63  ;;  %vm848_vm8 = vcmp.eq.f32.partialorder %v398_v15, 8.507059e+37  ;;  %v401_v38 = vor.u32 1.1754944e-38, %v400_v16 }
  0xc0   : > { %v282_v5 = vpop.f32.mrf.mxu0  ;;  %vm863_vm11 = vcmp.eq.f32.partialorder %v353_v23, 8.507059e+37  ;;  %v356_v44 = vor.u32 1.1754944e-38, %v355_v29 }
  0xc1   : > { %v644_v6 = vpop.eup %643  ;;  %v589_v7 = vmul.f32 -1.442695, %v292_v3  ;;  %v283_v8 = vadd.f32 %v817_v39, %v282_v5  ;;  %v332_v9 = vmul.f32 %v642_v61, %v331_v4 }
  0xc2   : > { %v646_v11 = vpop.eup %645  ;;  %v833_v12 = vadd.f32 1.0, %v644_v6 }
  0xc3   : > { %v648_v17 = vpop.eup %647  ;;  %651 = vpow2.f32 %v589_v7  ;;  %v586_v18 = vmul.f32 -1.442695, %v283_v8  ;;  %v333_v19 = vadd.f32 %v642_v61, %v332_v9  ;;  %v390_v20 = vmul.f32 %v646_v11, %v325_v58 }
  0xc4   : > { %v650_v21 = vpop.eup %649  ;;  %653 = vrcp.f32 %v833_v12  ;;  %v840_v22 = vadd.f32 1.0, %v648_v17  ;;  %vm395_vm5 = vweird.f32 %v646_v11  ;;  %v413_v45 = vand.u32 2147483647, %v833_v12 }
  0xc5   : > { %655 = vpow2.f32 %v586_v18  ;;  %v337_v24 = vsel %vm835_vm3, %v642_v61, %v333_v19  ;;  %v391_v25 = vsub.f32 1.0, %v390_v20  ;;  %v345_v26 = vmul.f32 %v650_v21, %v322_v62  ;;  %vm852_vm9 = vmor %vm394_vm7, %vm395_vm5 }
  0xc6   : > { %657 = vrcp.f32 %v840_v22  ;;  %v294_v27 = vpop.f32.mrf.mxu2  ;;  %v342_v28 = vsel %vm829_vm2, %v341_v14, %v337_v24  ;;  %vm350_vm6 = vweird.f32 %v650_v21  ;;  %v415_v53 = vand.u32 2147483648, %v833_v12 }
  0xc7   : > { %v295_v30 = vadd.f32 %v817_v39, %v294_v27  ;;  %485 = vmatmul.f32.vlgmr.msra.gmra.mxu1 %v342_v28  ;;  %v392_v31 = vmul.f32 %v646_v11, %v391_v25  ;;  %v346_v32 = vsub.f32 1.0, %v345_v26  ;;  %vm859_vm10 = vmor %vm349_vm4, %vm350_vm6  ;;  %vm364_vm12 = vweird.f32 %v840_v22 }
  0xc8   : > { %v370_v58 = vand.u32 2147483648, %v840_v22  ;;  %v368_v61 = vand.u32 2147483647, %v840_v22  ;;  %vm409_vm15 = vweird.f32 %v833_v12  ;;  %vm414_vm1 = vcmp.eq.f32.partialorder %v413_v45, 8.507059e+37 }
  0xc9   : > { %v652_v34 = vpop.eup %651  ;;  %v590_v35 = vmul.f32 -1.442695, %v295_v30  ;;  %v393_v36 = vadd.f32 %v646_v11, %v392_v31  ;;  %v347_v40 = vmul.f32 %v650_v21, %v346_v32  ;;  %v416_v3 = vor.u32 1.1754944e-38, %v415_v53 }
  0xca   : > { %v654_v41 = vpop.eup %653  ;;  %v856_v39 = vadd.f32 1.0, %v652_v34  ;;  %v371_v5 = vor.u32 1.1754944e-38, %v370_v58  ;;  %vm369_vm3 = vcmp.eq.f32.partialorder %v368_v61, 8.507059e+37 }
  0xcb   : > { %v656_v46 = vpop.eup %655  ;;  %659 = vpow2.f32 %v590_v35  ;;  %v397_v47 = vsel %vm852_vm9, %v646_v11, %v393_v36  ;;  %v348_v48 = vadd.f32 %v650_v21, %v347_v40  ;;  %v405_v49 = vmul.f32 %v654_v41, %v833_v12 }
  0xcc   : > { %v658_v50 = vpop.eup %657  ;;  %661 = vrcp.f32 %v856_v39  ;;  %v324_v51 = vadd.f32 1.0, %v656_v46  ;;  %v402_v52 = vsel %vm848_vm8, %v401_v38, %v397_v47  ;;  %vm410_vm13 = vweird.f32 %v654_v41 }
  0xcd   : > { %497 = vmatmul.f32.vlgmr.msra.gmra.mxu3 %v402_v52  ;;  %v352_v54 = vsel %vm859_vm10, %v650_v21, %v348_v48  ;;  %v406_v55 = vsub.f32 1.0, %v405_v49  ;;  %v360_v56 = vmul.f32 %v658_v50, %v840_v22  ;;  %vm365_vm14 = vweird.f32 %v658_v50  ;;  %vm411_vm0 = vmor %vm409_vm15, %vm410_vm13 }
  0xce   : > { %663 = vrcp.f32 %v324_v51  ;;  %v357_v57 = vsel %vm863_vm11, %v356_v44, %v352_v54  ;;  %vm886_vm2 = vmor %vm364_vm12, %vm365_vm14  ;;  %v428_v11 = vand.u32 2147483647, %v856_v39  ;;  %v430_v14 = vand.u32 2147483648, %v856_v39 }
  0xcf   : > { %488 = vmatmul.f32.gmra.mxu1 %v357_v57  ;;  %v407_v59 = vmul.f32 %v654_v41, %v406_v55  ;;  %v361_v60 = vsub.f32 1.0, %v360_v56  ;;  %vm379_vm5 = vweird.f32 %v324_v51  ;;  %v385_v17 = vand.u32 2147483648, %v324_v51 }
  0xd0   : > { %v383_v20 = vand.u32 2147483647, %v324_v51  ;;  %vm424_vm7 = vweird.f32 %v856_v39  ;;  %vm429_vm9 = vcmp.eq.f32.partialorder %v428_v11, 8.507059e+37  ;;  %v431_v24 = vor.u32 1.1754944e-38, %v430_v14 }
  0xd1   : > { %v660_v62 = vpop.eup %659  ;;  %v408_v63 = vadd.f32 %v654_v41, %v407_v59  ;;  %v362_v0 = vmul.f32 %v658_v50, %v361_v60  ;;  %v386_v25 = vor.u32 1.1754944e-38, %v385_v17 }
  0xd2   : > { %v662_v1 = vpop.eup %661  ;;  %v328_v2 = vadd.f32 1.0, %v660_v62  ;;  %vm384_vm11 = vcmp.eq.f32.partialorder %v383_v20, 8.507059e+37 }
  0xd3   : > { %v412_v6 = vsel %vm411_vm0, %v654_v41, %v408_v63  ;;  %v363_v7 = vadd.f32 %v658_v50, %v362_v0  ;;  %v420_v8 = vmul.f32 %v662_v1, %v856_v39  ;;  %vm425_vm4 = vweird.f32 %v662_v1  ;;  %v634_v41 = vld [vmem:[%s911_s4] ss:$0 sm:$0xff] }
  0xd4   : > { %v664_v9 = vpop.eup %663  ;;  %665 = vrcp.f32 %v328_v2  ;;  %v417_v10 = vsel %vm414_vm1, %v416_v3, %v412_v6  ;;  %vm426_vm8 = vmor %vm424_vm7, %vm425_vm4  ;;  %v445_v33 = vand.u32 2147483648, %v328_v2  ;;  %v443_v35 = vand.u32 2147483647, %v328_v2 }
  0xd5   : > { %500 = vmatmul.f32.gmra.mxu3 %v417_v10  ;;  %v367_v12 = vsel %vm886_vm2, %v658_v50, %v363_v7  ;;  %v421_v13 = vsub.f32 1.0, %v420_v8  ;;  %v375_v15 = vmul.f32 %v664_v9, %v324_v51  ;;  %vm380_vm6 = vweird.f32 %v664_v9 }
  0xd6   : > { %v372_v16 = vsel %vm369_vm3, %v371_v5, %v367_v12  ;;  %vm381_vm10 = vmor %vm379_vm5, %vm380_vm6  ;;  %vm439_vm13 = vweird.f32 %v328_v2  ;;  %v446_v37 = vor.u32 1.1754944e-38, %v445_v33  ;;  %vm444_vm15 = vcmp.eq.f32.partialorder %v443_v35, 8.507059e+37 }
  0xd7   : > { %491 = vmatmul.f32.gmra.mxu1 %v372_v16  ;;  %v422_v18 = vmul.f32 %v662_v1, %v421_v13  ;;  %v376_v19 = vsub.f32 1.0, %v375_v15 }
  0xd9   : > { %v423_v21 = vadd.f32 %v662_v1, %v422_v18  ;;  %v377_v22 = vmul.f32 %v664_v9, %v376_v19 }
  0xda   : > { %v666_v23 = vpop.eup %665 }
  0xdb   : > { %v427_v26 = vsel %vm426_vm8, %v662_v1, %v423_v21  ;;  %v378_v27 = vadd.f32 %v664_v9, %v377_v22  ;;  %v435_v28 = vmul.f32 %v666_v23, %v328_v2  ;;  %vm440_vm12 = vweird.f32 %v666_v23 }
  0xdc   : > { %v432_v29 = vsel %vm429_vm9, %v431_v24, %v427_v26  ;;  %vm441_vm14 = vmor %vm439_vm13, %vm440_vm12 }
  0xdd   : > { %503 = vmatmul.f32.gmra.mxu3 %v432_v29  ;;  %v382_v30 = vsel %vm381_vm10, %v664_v9, %v378_v27  ;;  %v436_v31 = vsub.f32 1.0, %v435_v28 }
  0xde   : > { %v387_v32 = vsel %vm384_vm11, %v386_v25, %v382_v30 }
  0xdf   : > { %494 = vmatmul.f32.gmra.mxu1 %v387_v32  ;;  %v437_v34 = vmul.f32 %v666_v23, %v436_v31 }
  0xe1   : > { %v438_v36 = vadd.f32 %v666_v23, %v437_v34 }
  0xe3   : > { %v442_v38 = vsel %vm441_vm14, %v666_v23, %v438_v36 }
  0xe4   : > { %v447_v40 = vsel %vm444_vm15, %v446_v37, %v442_v38 }
  0xe5   : > { %506 = vmatmul.f32.gmra.mxu3 %v447_v40 }
 0x144   : > { %v486_v39 = vpop.f32.mrf.mxu1 }
 0x145   : > { %v487_v42 = vadd.f32 %v634_v41, %v486_v39 }
 0x147   : > { %510 = vst [vmem:[%s226_s27] sm:$0xff] %v487_v42 }
 0x14c   : > { %v489_v43 = vpop.f32.mrf.mxu1 }
 0x14d   : > { %v490_v44 = vadd.f32 %v634_v41, %v489_v43 }
 0x14f   : > { %511 = vst [vmem:[%s226_s27 + $0x8] sm:$0xff] %v490_v44 }
 0x150   : > { %v498_v45 = vpop.f32.mrf.mxu3 }
 0x151   : > { %v499_v46 = vadd.f32 %v634_v41, %v498_v45 }
 0x153   : > { %514 = vst [vmem:[%s226_s27 + $0x20] sm:$0xff] %v499_v46 }
 0x154   : > { %v492_v47 = vpop.f32.mrf.mxu1 }
 0x155   : > { %v493_v48 = vadd.f32 %v634_v41, %v492_v47 }
 0x157   : > { %512 = vst [vmem:[%s226_s27 + $0x10] sm:$0xff] %v493_v48 }
 0x158   : > { %v501_v49 = vpop.f32.mrf.mxu3 }
 0x159   : > { %v502_v50 = vadd.f32 %v634_v41, %v501_v49 }
 0x15b   : > { %515 = vst [vmem:[%s226_s27 + $0x28] sm:$0xff] %v502_v50 }
 0x15c   : > { %v495_v51 = vpop.f32.mrf.mxu1 }
 0x15d   : > { %v496_v52 = vadd.f32 %v634_v41, %v495_v51 }
 0x15f   : > { %513 = vst [vmem:[%s226_s27 + $0x18] sm:$0xff] %v496_v52 }
 0x160   : > { %v504_v53 = vpop.f32.mrf.mxu3 }
 0x161   : > { %v505_v54 = vadd.f32 %v634_v41, %v504_v53 }
 0x163   : > { %516 = vst [vmem:[%s226_s27 + $0x30] sm:$0xff] %v505_v54 }
 0x168   : > { %v507_v55 = vpop.f32.mrf.mxu3 }
 0x169   : > { %v508_v56 = vadd.f32 %v634_v41, %v507_v55 }
 0x16b   : > { %517 = vst [vmem:[%s226_s27 + $0x38] sm:$0xff] %v508_v56 }
 0x16c PF: > { %s15_s18 = sadd.s32 1, %s673_s18  }
 0x16d   : > { %p12_p4 = scmp.ge.s32.totalorder %s15_s18, 6  }
 0x16f   :  { %14 = sbr.rel (!%p12_p4) target bundleno = 1 (0x1), region = 70 }

</bundles_post_ra>
